<compile_context>
chip_gen: v5e
topology: v5e:2x2
jax: 0.10.0
libtpu: 0.0.40
codegen_flags: <defaults>
</compile_context>

<pallas_src>
import functools

import jax
import jax.numpy as jnp
from jax.experimental import pallas as pl
from jax.experimental.pallas import tpu as pltpu

LN_EPS = 1e-5  # torch.nn.LayerNorm default


def _token_merge_kernel(x_ref, w_ref, b_ref, o_ref):
    # x_ref : (TR, 2D)  merged-token rows (pipelined input stream)
    # w_ref : (2D, D)   gamma-scaled, transposed reduce weight (bf16, resident)
    # b_ref : (1, D)    beta @ W.T (f32, resident)
    # o_ref : (TR, D)
    x = x_ref[...].astype(jnp.float32)
    inv_n = 1.0 / x.shape[-1]
    # One-pass LayerNorm statistics: var = E[x^2] - mean^2 (clamped >= 0).
    s1 = jnp.sum(x, axis=-1, keepdims=True)
    s2 = jnp.sum(x * x, axis=-1, keepdims=True)
    mean = s1 * inv_n
    var = jnp.maximum(s2 * inv_n - mean * mean, 0.0)
    xn = (x - mean) * jax.lax.rsqrt(var + LN_EPS)        # f32 LN, rsqrt on EUP
    acc = jnp.dot(xn.astype(w_ref.dtype), w_ref[...],
                  preferred_element_type=jnp.float32)    # bf16 MXU, f32 acc
    o_ref[...] = (acc + b_ref[...]).astype(o_ref.dtype)


def _select_tile_rows(n_rows, two_d, itemsize):
    """Byte-budget row tiling: ~2 MiB per x tile, 8-row aligned, balanced grid."""
    if n_rows <= 8:
        return max(n_rows, 1)
    target_bytes = 2 * 1024 * 1024
    tr = max(8, min(target_bytes // (two_d * itemsize), 1024))
    tr = min(tr, (n_rows // 8) * 8)          # keep the block within the array
    tr = max((tr // 8) * 8, 8)
    # v7x has 2 TensorCores: avoid tiny odd step counts (e.g. grid=3) that
    # leave one core with ~33% less work.
    g = pl.cdiv(n_rows, tr)
    if 1 < g < 16 and g % 2 == 1:
        tr_alt = ((pl.cdiv(n_rows, g + 1) + 7) // 8) * 8
        tr_alt = min(max(tr_alt, 8), (n_rows // 8) * 8)
        if tr_alt >= 8:
            tr = tr_alt
    return tr


@functools.partial(jax.jit, static_argnames=("tile_rows",))
def token_merging_pallas(x, gamma, beta, weight, *, tile_rows=None):
    """x: (B, L, D); gamma/beta: (2D,); weight: (D, 2D) as in nn.Linear."""
    B, L, D = x.shape
    two_d = 2 * D

    # Odd-length: duplicate last token (matches torch.cat([x, x[:, -1:, :]], 1)).
    # TODO(synk): fold the duplicated tail row into the kernel (per-batch grid +
    # in-kernel fixup) to avoid this extra HBM pass when L is odd.
    if L % 2 != 0:
        x = jnp.concatenate([x, x[:, -1:, :]], axis=1)
        L = L + 1
    L2 = L // 2

    # Zero-copy token pairing: row-major reshape == pair-adjacent + concat.
    R = B * L2
    x_flat = x.reshape(R, two_d)

    if tile_rows is None:
        tile_rows = _select_tile_rows(R, two_d, x.dtype.itemsize)
    tile_rows = max(1, min(tile_rows, R))

    # Fold LayerNorm affine into the reduce weight / an output bias.
    w_t = weight.astype(jnp.float32).T                              # (2D, D)
    w_scaled = (gamma.astype(jnp.float32)[:, None] * w_t).astype(jnp.bfloat16)
    bias_out = (beta.astype(jnp.float32) @ w_t).reshape(1, D)       # (1, D) f32

    # Non-divisible grid: the final partial block's OOB input rows are garbage,
    # but every row is independent and those output rows are masked off, so no
    # padding pass over x is needed.
    grid = (pl.cdiv(R, tile_rows),)

    # Explicit VMEM budget: double-buffered x/out stream, single-buffered
    # resident weight/bias, plus in-kernel f32 temps, with ~50% headroom.
    footprint = (
        2 * tile_rows * two_d * x.dtype.itemsize     # x tiles (double-buffered)
        + 2 * tile_rows * D * x.dtype.itemsize       # out tiles (double-buffered)
        + two_d * D * 2                              # weight (bf16, 1 buffer)
        + D * 4                                      # bias (f32, 1 buffer)
        + 3 * tile_rows * two_d * 4                  # f32 x / xn temps
        + tile_rows * D * 4                          # f32 accumulator
    )
    vmem_limit = int(min(max(footprint * 3 // 2, 32 * 1024 * 1024),
                         64 * 1024 * 1024))

    out_flat = pl.pallas_call(
        _token_merge_kernel,
        out_shape=jax.ShapeDtypeStruct((R, D), x.dtype),
        grid_spec=pltpu.PrefetchScalarGridSpec(
            num_scalar_prefetch=0,
            grid=grid,
            in_specs=[
                pl.BlockSpec((tile_rows, two_d), lambda i: (i, 0)),   # x rows
                pl.BlockSpec((two_d, D), lambda i: (0, 0),
                             pipeline_mode=pl.Buffered(1)),           # weight
                pl.BlockSpec((1, D), lambda i: (0, 0),
                             pipeline_mode=pl.Buffered(1)),           # bias
            ],
            out_specs=pl.BlockSpec((tile_rows, D), lambda i: (i, 0)),
        ),
        compiler_params=pltpu.CompilerParams(
            dimension_semantics=("parallel",),
            vmem_limit_bytes=vmem_limit,
        ),
    )(x_flat, w_scaled, bias_out)

    return out_flat.reshape(B, L2, D)


def token_merging_ref(x, gamma, beta, weight):
    """Pure-JAX f32 reference (mirrors the PyTorch module)."""
    B, L, D = x.shape
    if L % 2 != 0:
        x = jnp.concatenate([x, x[:, -1:, :]], axis=1)
    x0 = x[:, 0::2, :]
    x1 = x[:, 1::2, :]
    xc = jnp.concatenate([x0, x1], axis=-1).astype(jnp.float32)
    mean = jnp.mean(xc, axis=-1, keepdims=True)
    var = jnp.mean((xc - mean) ** 2, axis=-1, keepdims=True)
    xn = (xc - mean) / jnp.sqrt(var + LN_EPS)
    y = xn * gamma.astype(jnp.float32) + beta.astype(jnp.float32)
    return (y @ weight.astype(jnp.float32).T).astype(x.dtype)


if __name__ == "__main__":
    key = jax.random.PRNGKey(0)
    B, L, D = 2, 8, 32
    k_x, k_w, k_g, k_b, k_x2 = jax.random.split(key, 5)

    x = jax.random.normal(k_x, (B, L, D), dtype=jnp.float32)
    # nn.Linear(2*D, D, bias=False): weight shape (D, 2*D)
    weight = jax.random.normal(k_w, (D, 2 * D), dtype=jnp.float32) * 0.05
    # nn.LayerNorm(2*D) affine params (perturbed deterministically)
    gamma = 1.0 + 0.01 * jax.random.normal(k_g, (2 * D,), dtype=jnp.float32)
    beta = 0.01 * jax.random.normal(k_b, (2 * D,), dtype=jnp.float32)

    out = token_merging_pallas(x, gamma, beta, weight)
    out = jax.block_until_ready(out)
    ref = token_merging_ref(x, gamma, beta, weight)
    assert out.shape == (B, L // 2, D), out.shape
    # bf16 MXU path -> loosened tolerance vs the f32 reference.
    assert jnp.allclose(out, ref, atol=2e-2, rtol=2e-2), "mismatch vs reference"

    # Secondary check: odd L + row count that does not divide the tile
    # (exercises the non-divisible grid / masked boundary block path).
    x2 = jax.random.normal(k_x2, (3, 13, D), dtype=jnp.float32)
    out2 = jax.block_until_ready(token_merging_pallas(x2, gamma, beta, weight))
    ref2 = token_merging_ref(x2, gamma, beta, weight)
    assert out2.shape == (3, 7, D), out2.shape
    assert jnp.allclose(out2, ref2, atol=2e-2, rtol=2e-2), "mismatch (odd L)"

    print("KERNEL_OK")
</pallas_src>

<mosaic_0001>
module attributes {stable_mosaic.version = 11 : i64} {
  func.func @_token_merge_kernel(%arg0: i32, %arg1: memref<8x64xf32, #tpu.memory_space<vmem>>, %arg2: memref<64x32xbf16, #tpu.memory_space<vmem>>, %arg3: memref<1x32xf32, #tpu.memory_space<vmem>>, %arg4: memref<8x32xf32, #tpu.memory_space<vmem>>) attributes {dimension_semantics = [#tpu.dimension_semantics<parallel>], iteration_bounds = array<i64: 1>, scalar_prefetch = 0 : i64, scratch_operands = 0 : i64, tpu.core_type = #tpu.core_type<tc>, window_params = [{transform_indices = @transform_0, window_bounds = array<i64: 8, 64>}, {pipeline_mode = #tpu.pipeline_mode<synchronous>, transform_indices = @transform_1, window_bounds = array<i64: 64, 32>}, {pipeline_mode = #tpu.pipeline_mode<synchronous>, transform_indices = @transform_2, window_bounds = array<i64: 1, 32>}, {transform_indices = @transform_3, window_bounds = array<i64: 8, 32>}]} {
    %c0 = arith.constant 0 : index
    %c0_0 = arith.constant 0 : index
    %0 = vector.load %arg1[%c0, %c0_0] : memref<8x64xf32, #tpu.memory_space<vmem>>, vector<8x64xf32>
    %cst = arith.constant dense<0.000000e+00> : vector<8xf32>
    %1 = vector.multi_reduction <add>, %0, %cst [1] : vector<8x64xf32> to vector<8xf32>
    %2 = vector.shape_cast %1 : vector<8xf32> to vector<8x1xf32>
    %3 = arith.mulf %0, %0 : vector<8x64xf32>
    %cst_1 = arith.constant dense<0.000000e+00> : vector<8xf32>
    %4 = vector.multi_reduction <add>, %3, %cst_1 [1] : vector<8x64xf32> to vector<8xf32>
    %5 = vector.shape_cast %4 : vector<8xf32> to vector<8x1xf32>
    %cst_2 = arith.constant 1.562500e-02 : f32
    %6 = vector.broadcast %cst_2 : f32 to vector<8x1xf32>
    %7 = arith.mulf %2, %6 : vector<8x1xf32>
    %cst_3 = arith.constant 1.562500e-02 : f32
    %8 = vector.broadcast %cst_3 : f32 to vector<8x1xf32>
    %9 = arith.mulf %5, %8 : vector<8x1xf32>
    %10 = arith.mulf %7, %7 : vector<8x1xf32>
    %11 = arith.subf %9, %10 : vector<8x1xf32>
    %cst_4 = arith.constant 0.000000e+00 : f32
    %12 = vector.broadcast %cst_4 : f32 to vector<8x1xf32>
    %13 = arith.maximumf %11, %12 : vector<8x1xf32>
    %14 = vector.broadcast %7 : vector<8x1xf32> to vector<8x64xf32>
    %15 = arith.subf %0, %14 : vector<8x64xf32>
    %cst_5 = arith.constant 9.99999974E-6 : f32
    %16 = vector.broadcast %cst_5 : f32 to vector<8x1xf32>
    %17 = arith.addf %13, %16 : vector<8x1xf32>
    %18 = math.rsqrt %17 : vector<8x1xf32>
    %19 = vector.broadcast %18 : vector<8x1xf32> to vector<8x64xf32>
    %20 = arith.mulf %15, %19 : vector<8x64xf32>
    %21 = arith.truncf %20 : vector<8x64xf32> to vector<8x64xbf16>
    %c0_6 = arith.constant 0 : index
    %c0_7 = arith.constant 0 : index
    %22 = vector.load %arg2[%c0_6, %c0_7] : memref<64x32xbf16, #tpu.memory_space<vmem>>, vector<64x32xbf16>
    %cst_8 = arith.constant dense<0.000000e+00> : vector<8x32xf32>
    %23 = tpu.matmul %21, %22, %cst_8 {dimension_numbers = #tpu.dot_dimension_numbers<[1], [0], [0], [1], [0, 0, 1, 1], [], []>} : vector<8x64xbf16>, vector<64x32xbf16>, vector<8x32xf32> -> vector<8x32xf32>
    %c0_9 = arith.constant 0 : index
    %c0_10 = arith.constant 0 : index
    %24 = vector.load %arg3[%c0_9, %c0_10] : memref<1x32xf32, #tpu.memory_space<vmem>>, vector<1x32xf32>
    %25 = vector.broadcast %24 : vector<1x32xf32> to vector<8x32xf32>
    %26 = arith.addf %23, %25 : vector<8x32xf32>
    %c0_11 = arith.constant 0 : index
    %c0_12 = arith.constant 0 : index
    %27 = vector.load %arg4[%c0_11, %c0_12] : memref<8x32xf32, #tpu.memory_space<vmem>>, vector<8x32xf32>
    tpu.vector_store %arg4[%c0_11, %c0_12], %26 {strides = array<i32>} : memref<8x32xf32, #tpu.memory_space<vmem>>, vector<8x32xf32>,
    return
  }
  func.func @transform_0(%arg0: i32) -> (i32, i32) {
    %c0_i32 = arith.constant 0 : i32
    %c0_i32_0 = arith.constant 0 : i32
    return %arg0, %c0_i32 : i32, i32
  }
  func.func @transform_1(%arg0: i32) -> (i32, i32) {
    %c0_i32 = arith.constant 0 : i32
    %c0_i32_0 = arith.constant 0 : i32
    %c0_i32_1 = arith.constant 0 : i32
    return %c0_i32, %c0_i32_0 : i32, i32
  }
  func.func @transform_2(%arg0: i32) -> (i32, i32) {
    %c0_i32 = arith.constant 0 : i32
    %c0_i32_0 = arith.constant 0 : i32
    %c0_i32_1 = arith.constant 0 : i32
    return %c0_i32, %c0_i32_0 : i32, i32
  }
  func.func @transform_3(%arg0: i32) -> (i32, i32) {
    %c0_i32 = arith.constant 0 : i32
    %c0_i32_0 = arith.constant 0 : i32
    return %arg0, %c0_i32 : i32, i32
  }
}

</mosaic_0001>

<bundles_post_ra>
// kernel: token_merging_pallas.1
= control target key start
LH: loop header
LB: loop body
LE: loop exit
PB: predicated region body
PF: predicated region fallthrough
CT: control target
= control target key end

     0   :  { %vm17_vm0 = vcmask 523264   ;;  %s210_s0 = inlined_call_operand.vmem [shape: f32[8,64], index: 0, kind: input, shape index: {}]   ;;  %s211_s1 = inlined_call_operand.vmem [shape: bf16[64,32], index: 1, kind: input, shape index: {}]   ;;  %s212_s2 = inlined_call_operand.vmem [shape: f32[1,32], index: 2, kind: input, shape index: {}]   ;;  %s213_s3 = inlined_call_operand.hbm [shape: f32[8,32], index: 3, kind: output, shape index: {}]  }
   0x1   :  { %v16_v0 = vld [vmem:[%s210_s0] sm:$0xff] }
   0x2   :  { %8 = vsyncpa [#allocation3], 0  ;;  %v18_v1 = vsel %vm17_vm0, %v16_v0, 0.0  ;;  %v21_v2 = vmul.f32 %v16_v0, %v16_v0  ;;  %v134_v4 = vld [vmem:[%s211_s1 + $0x18] sm:$0xff]  ;;  %v133_v5 = vld [vmem:[%s211_s1 + $0x10] sm:$0xff]  ;;  %s165_s22 = smov [#allocation2]  }
   0x3   :  { %19 = vadd.xlane.f32.xlu0 %v18_v1  ;;  %87 = vmatpush.bf16.msra.mxu0 %v134_v4  ;;  %v132_v6 = vld [vmem:[%s211_s1 + $0x8] sm:$0xff]  ;;  %v131_v8 = vld [vmem:[%s211_s1] sm:$0xff]  ;;  %s103_s23 = sshll.u32 %s165_s22, 4  ;;  %s105_s26 = sshll.u32 %s213_s3, 4  ;;  %vm96_vm4 = vcmask 261120   ;;  %s104_s23 = int_to_ptr.vmem [resolvable:$true] %s103_s23  ;;  %s106_s26 = int_to_ptr.hbm [resolvable:$true] %s105_s26 }
   0x4   :  { %v22_v3 = vsel %vm17_vm0, %v21_v2, 0.0  ;;  %v136_v26 = vld [vmem:[%s212_s2] ss:$0 sm:$0xff] }
   0x7   :  { %88 = vmatpush.bf16.msra.mxu0 %v133_v5 }
   0xb   :  { %23 = vadd.xlane.f32.xlu0 %v22_v3  ;;  %89 = vmatpush.bf16.msra.mxu0 %v132_v6 }
   0xf   :  { %90 = vmatpush.bf16.msra.mxu0 %v131_v8 }
  0x76   :  { %v20_v7 = vpop.xlane.xlu0 %19 }
  0x77   :  { %v25_v9 = vmul.f32 0.015625, %v20_v7 }
  0x79   :  { %v27_v11 = vmul.f32 %v25_v9, %v25_v9  ;;  %v30_v22 = vsub.f32 %v16_v0, %v25_v9 }
  0x7e   :  { %v24_v10 = vpop.xlane.xlu0 %23 }
  0x7f   :  { %v26_v12 = vmul.f32 0.015625, %v24_v10 }
  0x81   :  { %v28_v13 = vsub.f32 %v26_v12, %v27_v11 }
  0x83   :  { %v29_v14 = vmax.f32 %v28_v13, 0.0 }
  0x85   :  { %v31_v15 = vadd.f32 1e-05, %v29_v14 }
  0x87   :  { %137 = vrsqrt.f32 %v31_v15  ;;  %vm38_vm2 = vweird.f32 %v31_v15 }
  0x8d   :  { %v138_v16 = vpop.eup %137 }
  0x8e   :  { %v33_v17 = vmul.f32 %v138_v16, %v31_v15  ;;  %vm39_vm1 = vweird.f32 %v138_v16 }
  0x8f   :  { %vm40_vm3 = vmor %vm38_vm2, %vm39_vm1 }
  0x90   :  { %v34_v18 = vmul.f32 %v138_v16, %v33_v17 }
  0x92   :  { %v35_v19 = vmul.f32 0.5, %v34_v18 }
  0x94   :  { %v36_v20 = vsub.f32 1.5, %v35_v19 }
  0x96   :  { %v37_v21 = vmul.f32 %v138_v16, %v36_v20 }
  0x98   :  { %v41_v23 = vsel %vm40_vm3, %v138_v16, %v37_v21 }
  0x99   :  { %v42_v24 = vmul.f32 %v41_v23, %v30_v22 }
  0x9b   :  { %v43_v25 = vpack.c.bf16 %v42_v24, %v42_v24 }
  0x9d   :  { %130 = vmatmul.msk.bf16.vlgmr.msra.gmra.mxu0 %vm17_vm0, %v43_v25 }
 0x11a   :  { %v92_v27 = vpop.f32.mrf.mxu0 }
 0x11b   :  { %v93_v28 = vadd.f32 %v136_v26, %v92_v27 }
 0x11d   :  { %97 = vst.msk [vmem:[#allocation2] sm:$0xff] %vm96_vm4, %v93_v28 }
 0x11e   :  { %108 = dma.vmem_to_hbm [thread:$0]  %s104_s23, 128, %s106_s26, [#allocation3]  }
 0x122   :  { %v94_v29 = vpop.f32.mrf.mxu0 }
 0x123   :  { %163 = dma.done.wait [#allocation3], 128  }
 0x124   :  { %164 = vsyncadd [#allocation3], 4294967168 }
 0x125   :  { %113 = vsyncpa [#allocation3], 1 }

</bundles_post_ra>
